<compile_context>
chip_gen: v5e
topology: v5e:2x2
jax: 0.10.0
libtpu: 0.0.40
codegen_flags: <defaults>
</compile_context>

<pallas_src>
import functools

import jax
import jax.numpy as jnp
from jax.experimental import pallas as pl
from jax.experimental.pallas import tpu as pltpu


# ----------------------------------------------------------------------------
# Synthetic config (mirrors the module's __init__ shape decisions)
# ----------------------------------------------------------------------------
IN_CHANNELS = 4          # FPN channels fed into the box head
POOLER_RES = 4           # ROIAlign output resolution (R x R)
SPATIAL_SCALE = 1.0      # single feature level, stride 1 for simplicity
REP_SIZE = 32            # MLP representation size (fc6/fc7 width)
NUM_CLASSES = 3          # classification classes
POOLED_DIM = IN_CHANNELS * POOLER_RES * POOLER_RES          # 64
HEAD_OUT = NUM_CLASSES + NUM_CLASSES * 4 + NUM_CLASSES * 8  # 39 (cls|box|quad)

# Hardware-tile padded sizes (lane = 128).
LANE = 128
POOLED_PAD = max(LANE, ((POOLED_DIM + LANE - 1) // LANE) * LANE)   # 128
REP_PAD = max(LANE, ((REP_SIZE + LANE - 1) // LANE) * LANE)        # 128
HEAD_PAD = max(LANE, ((HEAD_OUT + LANE - 1) // LANE) * LANE)       # 128
TM = 128                 # row (ROI) tile; grid scales with #proposals


# ----------------------------------------------------------------------------
# Pallas kernel: fused MLP feature extractor + fused predictor head
#   h6 = relu(x @ W6 + b6); h7 = relu(h6 @ W7 + b7)
#   head = h7 @ [Wc|Wb|Wq] + [bc|bb|bq]      (single lane-dense output slab)
# ----------------------------------------------------------------------------
def _box_head_kernel(x_ref, w6_ref, b6_ref, w7_ref, b7_ref, wh_ref, bh_ref,
                     feat_ref, head_ref):
    x = x_ref[...]                                           # bf16 [TM, Kp]
    h6 = jnp.dot(x, w6_ref[...], preferred_element_type=jnp.float32)
    h6 = jnp.maximum(h6 + b6_ref[...], 0.0)                  # f32 [TM, REP_PAD]
    h7 = jnp.dot(h6.astype(jnp.bfloat16), w7_ref[...],
                 preferred_element_type=jnp.float32)
    h7 = jnp.maximum(h7 + b7_ref[...], 0.0)                  # f32 [TM, REP_PAD]
    feat_ref[...] = h7
    head = jnp.dot(h7.astype(jnp.bfloat16), wh_ref[...],
                   preferred_element_type=jnp.float32)
    head_ref[...] = head + bh_ref[...]                       # f32 [TM, HEAD_PAD]


@functools.partial(jax.jit)
def box_head_mlp(pooled_flat, params):
    """pooled_flat: [N, POOLED_DIM] float32. Returns (feat, cls, box, quad)."""
    n = pooled_flat.shape[0]
    n_pad = pl.cdiv(n, TM) * TM
    w6p, b6p, w7p, b7p, whp, bhp = params

    # Pad rows to the row tile and features to the lane width, cast to bf16.
    xp = jnp.pad(pooled_flat,
                 ((0, n_pad - n), (0, POOLED_PAD - POOLED_DIM))
                 ).astype(jnp.bfloat16)

    grid = (n_pad // TM,)
    out_shape = (
        jax.ShapeDtypeStruct((n_pad, REP_PAD), jnp.float32),
        jax.ShapeDtypeStruct((n_pad, HEAD_PAD), jnp.float32),
    )
    in_specs = [
        pl.BlockSpec((TM, POOLED_PAD), lambda i: (i, 0)),       # activations
        pl.BlockSpec((POOLED_PAD, REP_PAD), lambda i: (0, 0)),  # fc6 W (resident)
        pl.BlockSpec((1, REP_PAD), lambda i: (0, 0)),           # fc6 b
        pl.BlockSpec((REP_PAD, REP_PAD), lambda i: (0, 0)),     # fc7 W (resident)
        pl.BlockSpec((1, REP_PAD), lambda i: (0, 0)),           # fc7 b
        pl.BlockSpec((REP_PAD, HEAD_PAD), lambda i: (0, 0)),    # fused head W
        pl.BlockSpec((1, HEAD_PAD), lambda i: (0, 0)),          # fused head b
    ]
    out_specs = (
        pl.BlockSpec((TM, REP_PAD), lambda i: (i, 0)),
        pl.BlockSpec((TM, HEAD_PAD), lambda i: (i, 0)),
    )

    feat_pad, head_pad = pl.pallas_call(
        _box_head_kernel,
        out_shape=out_shape,
        grid=grid,
        in_specs=in_specs,
        out_specs=out_specs,
        compiler_params=pltpu.CompilerParams(
            dimension_semantics=("parallel",),
            vmem_limit_bytes=64 * 1024 * 1024,
        ),
    )(xp, w6p, b6p, w7p, b7p, whp, bhp)

    feat = feat_pad[:n, :REP_SIZE]
    head = head_pad[:n, :HEAD_OUT]
    cls = head[:, :NUM_CLASSES]
    box = head[:, NUM_CLASSES:NUM_CLASSES + NUM_CLASSES * 4]
    quad = head[:, NUM_CLASSES + NUM_CLASSES * 4:HEAD_OUT]
    return feat, cls, box, quad


# ----------------------------------------------------------------------------
# ROIAlign (sampling_ratio = 1) — data-dependent bilinear gather in plain JAX.
# TODO(synk): fuse ROIAlign with fc6 via scalar-prefetch + manual DMA at
#             realistic sizes to avoid the pooled-tensor HBM round trip.
# TODO(synk): maskrcnn_benchmark zero-weights out-of-bounds samples; this
#             implementation clamps indices (edge replication) instead.
# ----------------------------------------------------------------------------
def roi_align_single(feat, rois):
    """feat: [C, H, W]; rois: [K, 4] (x1, y1, x2, y2). Returns [K, C, R, R]."""
    C, H, W = feat.shape
    K = rois.shape[0]
    R = POOLER_RES
    x1 = rois[:, 0] * SPATIAL_SCALE
    y1 = rois[:, 1] * SPATIAL_SCALE
    x2 = rois[:, 2] * SPATIAL_SCALE
    y2 = rois[:, 3] * SPATIAL_SCALE
    roi_w = jnp.maximum(x2 - x1, 1.0)
    roi_h = jnp.maximum(y2 - y1, 1.0)
    bin_w = roi_w / R
    bin_h = roi_h / R
    grid = jnp.arange(R, dtype=jnp.float32) + 0.5
    sx = x1[:, None] + grid[None, :] * bin_w[:, None]   # [K, R]
    sy = y1[:, None] + grid[None, :] * bin_h[:, None]   # [K, R]
    gy = jnp.broadcast_to(sy[:, :, None], (K, R, R))
    gx = jnp.broadcast_to(sx[:, None, :], (K, R, R))
    y0f = jnp.floor(gy)
    x0f = jnp.floor(gx)
    ly = gy - y0f
    lx = gx - x0f
    y0 = jnp.clip(y0f.astype(jnp.int32), 0, H - 1)
    y1i = jnp.clip(y0 + 1, 0, H - 1)
    x0 = jnp.clip(x0f.astype(jnp.int32), 0, W - 1)
    x1i = jnp.clip(x0 + 1, 0, W - 1)

    def gather(yi, xi):
        # feat[:, yi, xi] -> [C, K, R, R] -> [K, C, R, R]
        return feat[:, yi, xi].transpose(1, 0, 2, 3)

    v00 = gather(y0, x0)
    v01 = gather(y0, x1i)
    v10 = gather(y1i, x0)
    v11 = gather(y1i, x1i)
    wy = ly[:, None, :, :]
    wx = lx[:, None, :, :]
    return (v00 * (1.0 - wy) * (1.0 - wx) + v01 * (1.0 - wy) * wx
            + v10 * wy * (1.0 - wx) + v11 * wy * wx)


# ----------------------------------------------------------------------------
# Parameter init: PyTorch-style Linear weights -> padded / fused TPU layout.
# ----------------------------------------------------------------------------
def init_params(key):
    ks = jax.random.split(key, 5)

    def lin(k, fan_in, fan_out):
        # PyTorch Linear stores weight as [out, in]; transpose to [in, out].
        w = 0.05 * jax.random.normal(k, (fan_out, fan_in), jnp.float32)
        b = jnp.full((fan_out,), 0.01, jnp.float32)
        return w.T, b

    w6, b6 = lin(ks[0], POOLED_DIM, REP_SIZE)
    w7, b7 = lin(ks[1], REP_SIZE, REP_SIZE)
    wc, bc = lin(ks[2], REP_SIZE, NUM_CLASSES)
    wb, bb = lin(ks[3], REP_SIZE, NUM_CLASSES * 4)
    wq, bq = lin(ks[4], REP_SIZE, NUM_CLASSES * 8)

    def pad_w(w, rows, cols):
        return jnp.pad(w, ((0, rows - w.shape[0]), (0, cols - w.shape[1]))
                       ).astype(jnp.bfloat16)

    def pad_b(b, cols):
        return jnp.pad(b, (0, cols - b.shape[0])).reshape(1, cols).astype(jnp.float32)

    # Fuse the three predictor heads along the output dim (cls | box | quad).
    wh = jnp.concatenate([wc, wb, wq], axis=1)   # [REP_SIZE, HEAD_OUT]
    bh = jnp.concatenate([bc, bb, bq], axis=0)   # [HEAD_OUT]

    w6p = pad_w(w6, POOLED_PAD, REP_PAD)
    b6p = pad_b(b6, REP_PAD)
    w7p = pad_w(w7, REP_PAD, REP_PAD)
    b7p = pad_b(b7, REP_PAD)
    whp = pad_w(wh, REP_PAD, HEAD_PAD)
    bhp = pad_b(bh, HEAD_PAD)
    return (w6p, b6p, w7p, b7p, whp, bhp)


# ----------------------------------------------------------------------------
# ROIBoxHead.forward (inference path)
# ----------------------------------------------------------------------------
def roi_box_head_forward(features, proposals, params):
    """
    features : [B, C, H, W]  (NCHW, single FPN level)
    proposals: [B, K, 4]     (x1, y1, x2, y2) per image
    Returns (x, result, losses) mirroring the PyTorch forward in eval mode.
    """
    B, K = proposals.shape[0], proposals.shape[1]
    pooled = jax.vmap(roi_align_single)(features, proposals)   # [B, K, C, R, R]
    pooled_flat = pooled.reshape(B * K, POOLED_DIM)            # [N, C*R*R]

    x, class_logits, box_regression, quad_box_regression = box_head_mlp(
        pooled_flat, params)

    # TODO(synk): post_processor (softmax + box/quad decoding + per-class NMS)
    # has no clean Pallas equivalent; returning raw head outputs instead.
    result = (class_logits, box_regression, quad_box_regression)
    # TODO(synk): loss_evaluator.subsample + cross-entropy/smooth-L1 losses are
    # training-only and involve matching/sampling; eval path returns {}.
    losses = {}
    return x, result, losses


if __name__ == "__main__":
    key = jax.random.PRNGKey(0)
    k_feat, k_box, k_param = jax.random.split(key, 3)

    B, K, H, W = 2, 8, 16, 16
    features = jax.random.normal(k_feat, (B, IN_CHANNELS, H, W), jnp.float32)

    # Deterministic proposal boxes (x1, y1, x2, y2) within the 16x16 image.
    kx, ky, kw, kh = jax.random.split(k_box, 4)
    x1 = jax.random.uniform(kx, (B, K), minval=0.0, maxval=7.0)
    y1 = jax.random.uniform(ky, (B, K), minval=0.0, maxval=7.0)
    bw = jax.random.uniform(kw, (B, K), minval=2.0, maxval=8.0)
    bh = jax.random.uniform(kh, (B, K), minval=2.0, maxval=8.0)
    proposals = jnp.stack([x1, y1, x1 + bw, y1 + bh], axis=-1)  # [B, K, 4]

    params = init_params(k_param)

    x, result, losses = roi_box_head_forward(features, proposals, params)
    jax.block_until_ready((x,) + result)

    assert x.shape == (B * K, REP_SIZE)
    assert result[0].shape == (B * K, NUM_CLASSES)
    assert result[1].shape == (B * K, NUM_CLASSES * 4)
    assert result[2].shape == (B * K, NUM_CLASSES * 8)
    assert losses == {}
    print("KERNEL_OK")
</pallas_src>

<mosaic_0001>
module attributes {stable_mosaic.version = 11 : i64} {
  func.func @_box_head_kernel(%arg0: i32, %arg1: memref<128x128xbf16, #tpu.memory_space<vmem>>, %arg2: memref<128x128xbf16, #tpu.memory_space<vmem>>, %arg3: memref<1x128xf32, #tpu.memory_space<vmem>>, %arg4: memref<128x128xbf16, #tpu.memory_space<vmem>>, %arg5: memref<1x128xf32, #tpu.memory_space<vmem>>, %arg6: memref<128x128xbf16, #tpu.memory_space<vmem>>, %arg7: memref<1x128xf32, #tpu.memory_space<vmem>>, %arg8: memref<128x128xf32, #tpu.memory_space<vmem>>, %arg9: memref<128x128xf32, #tpu.memory_space<vmem>>) attributes {dimension_semantics = [#tpu.dimension_semantics<parallel>], iteration_bounds = array<i64: 1>, scalar_prefetch = 0 : i64, scratch_operands = 0 : i64, tpu.core_type = #tpu.core_type<tc>, window_params = [{transform_indices = @transform_0, window_bounds = array<i64: 128, 128>}, {pipeline_mode = #tpu.pipeline_mode<synchronous>, transform_indices = @transform_1, window_bounds = array<i64: 128, 128>}, {pipeline_mode = #tpu.pipeline_mode<synchronous>, transform_indices = @transform_2, window_bounds = array<i64: 1, 128>}, {pipeline_mode = #tpu.pipeline_mode<synchronous>, transform_indices = @transform_3, window_bounds = array<i64: 128, 128>}, {pipeline_mode = #tpu.pipeline_mode<synchronous>, transform_indices = @transform_4, window_bounds = array<i64: 1, 128>}, {pipeline_mode = #tpu.pipeline_mode<synchronous>, transform_indices = @transform_5, window_bounds = array<i64: 128, 128>}, {pipeline_mode = #tpu.pipeline_mode<synchronous>, transform_indices = @transform_6, window_bounds = array<i64: 1, 128>}, {transform_indices = @transform_7, window_bounds = array<i64: 128, 128>}, {transform_indices = @transform_8, window_bounds = array<i64: 128, 128>}]} {
    %c0 = arith.constant 0 : index
    %c0_0 = arith.constant 0 : index
    %0 = vector.load %arg1[%c0, %c0_0] : memref<128x128xbf16, #tpu.memory_space<vmem>>, vector<128x128xbf16>
    %c0_1 = arith.constant 0 : index
    %c0_2 = arith.constant 0 : index
    %1 = vector.load %arg2[%c0_1, %c0_2] : memref<128x128xbf16, #tpu.memory_space<vmem>>, vector<128x128xbf16>
    %cst = arith.constant dense<0.000000e+00> : vector<128x128xf32>
    %2 = tpu.matmul %0, %1, %cst {dimension_numbers = #tpu.dot_dimension_numbers<[1], [0], [0], [1], [0, 0, 1, 1], [], []>} : vector<128x128xbf16>, vector<128x128xbf16>, vector<128x128xf32> -> vector<128x128xf32>
    %c0_3 = arith.constant 0 : index
    %c0_4 = arith.constant 0 : index
    %3 = vector.load %arg3[%c0_3, %c0_4] : memref<1x128xf32, #tpu.memory_space<vmem>>, vector<1x128xf32>
    %4 = vector.broadcast %3 : vector<1x128xf32> to vector<128x128xf32>
    %5 = arith.addf %2, %4 : vector<128x128xf32>
    %cst_5 = arith.constant 0.000000e+00 : f32
    %6 = vector.broadcast %cst_5 : f32 to vector<128x128xf32>
    %7 = arith.maximumf %5, %6 : vector<128x128xf32>
    %8 = arith.truncf %7 : vector<128x128xf32> to vector<128x128xbf16>
    %c0_6 = arith.constant 0 : index
    %c0_7 = arith.constant 0 : index
    %9 = vector.load %arg4[%c0_6, %c0_7] : memref<128x128xbf16, #tpu.memory_space<vmem>>, vector<128x128xbf16>
    %cst_8 = arith.constant dense<0.000000e+00> : vector<128x128xf32>
    %10 = tpu.matmul %8, %9, %cst_8 {dimension_numbers = #tpu.dot_dimension_numbers<[1], [0], [0], [1], [0, 0, 1, 1], [], []>} : vector<128x128xbf16>, vector<128x128xbf16>, vector<128x128xf32> -> vector<128x128xf32>
    %c0_9 = arith.constant 0 : index
    %c0_10 = arith.constant 0 : index
    %11 = vector.load %arg5[%c0_9, %c0_10] : memref<1x128xf32, #tpu.memory_space<vmem>>, vector<1x128xf32>
    %12 = vector.broadcast %11 : vector<1x128xf32> to vector<128x128xf32>
    %13 = arith.addf %10, %12 : vector<128x128xf32>
    %cst_11 = arith.constant 0.000000e+00 : f32
    %14 = vector.broadcast %cst_11 : f32 to vector<128x128xf32>
    %15 = arith.maximumf %13, %14 : vector<128x128xf32>
    %c0_12 = arith.constant 0 : index
    %c0_13 = arith.constant 0 : index
    %16 = vector.load %arg8[%c0_12, %c0_13] : memref<128x128xf32, #tpu.memory_space<vmem>>, vector<128x128xf32>
    tpu.vector_store %arg8[%c0_12, %c0_13], %15 {strides = array<i32>} : memref<128x128xf32, #tpu.memory_space<vmem>>, vector<128x128xf32>,
    %17 = arith.truncf %15 : vector<128x128xf32> to vector<128x128xbf16>
    %c0_14 = arith.constant 0 : index
    %c0_15 = arith.constant 0 : index
    %18 = vector.load %arg6[%c0_14, %c0_15] : memref<128x128xbf16, #tpu.memory_space<vmem>>, vector<128x128xbf16>
    %cst_16 = arith.constant dense<0.000000e+00> : vector<128x128xf32>
    %19 = tpu.matmul %17, %18, %cst_16 {dimension_numbers = #tpu.dot_dimension_numbers<[1], [0], [0], [1], [0, 0, 1, 1], [], []>} : vector<128x128xbf16>, vector<128x128xbf16>, vector<128x128xf32> -> vector<128x128xf32>
    %c0_17 = arith.constant 0 : index
    %c0_18 = arith.constant 0 : index
    %20 = vector.load %arg7[%c0_17, %c0_18] : memref<1x128xf32, #tpu.memory_space<vmem>>, vector<1x128xf32>
    %21 = vector.broadcast %20 : vector<1x128xf32> to vector<128x128xf32>
    %22 = arith.addf %19, %21 : vector<128x128xf32>
    %c0_19 = arith.constant 0 : index
    %c0_20 = arith.constant 0 : index
    %23 = vector.load %arg9[%c0_19, %c0_20] : memref<128x128xf32, #tpu.memory_space<vmem>>, vector<128x128xf32>
    tpu.vector_store %arg9[%c0_19, %c0_20], %22 {strides = array<i32>} : memref<128x128xf32, #tpu.memory_space<vmem>>, vector<128x128xf32>,
    return
  }
  func.func @transform_0(%arg0: i32) -> (i32, i32) {
    %c0_i32 = arith.constant 0 : i32
    %c0_i32_0 = arith.constant 0 : i32
    return %arg0, %c0_i32 : i32, i32
  }
  func.func @transform_1(%arg0: i32) -> (i32, i32) {
    %c0_i32 = arith.constant 0 : i32
    %c0_i32_0 = arith.constant 0 : i32
    %c0_i32_1 = arith.constant 0 : i32
    return %c0_i32, %c0_i32_0 : i32, i32
  }
  func.func @transform_2(%arg0: i32) -> (i32, i32) {
    %c0_i32 = arith.constant 0 : i32
    %c0_i32_0 = arith.constant 0 : i32
    %c0_i32_1 = arith.constant 0 : i32
    return %c0_i32, %c0_i32_0 : i32, i32
  }
  func.func @transform_3(%arg0: i32) -> (i32, i32) {
    %c0_i32 = arith.constant 0 : i32
    %c0_i32_0 = arith.constant 0 : i32
    %c0_i32_1 = arith.constant 0 : i32
    return %c0_i32, %c0_i32_0 : i32, i32
  }
  func.func @transform_4(%arg0: i32) -> (i32, i32) {
    %c0_i32 = arith.constant 0 : i32
    %c0_i32_0 = arith.constant 0 : i32
    %c0_i32_1 = arith.constant 0 : i32
    return %c0_i32, %c0_i32_0 : i32, i32
  }
  func.func @transform_5(%arg0: i32) -> (i32, i32) {
    %c0_i32 = arith.constant 0 : i32
    %c0_i32_0 = arith.constant 0 : i32
    %c0_i32_1 = arith.constant 0 : i32
    return %c0_i32, %c0_i32_0 : i32, i32
  }
  func.func @transform_6(%arg0: i32) -> (i32, i32) {
    %c0_i32 = arith.constant 0 : i32
    %c0_i32_0 = arith.constant 0 : i32
    %c0_i32_1 = arith.constant 0 : i32
    return %c0_i32, %c0_i32_0 : i32, i32
  }
  func.func @transform_7(%arg0: i32) -> (i32, i32) {
    %c0_i32 = arith.constant 0 : i32
    %c0_i32_0 = arith.constant 0 : i32
    return %arg0, %c0_i32 : i32, i32
  }
  func.func @transform_8(%arg0: i32) -> (i32, i32) {
    %c0_i32 = arith.constant 0 : i32
    %c0_i32_0 = arith.constant 0 : i32
    return %arg0, %c0_i32 : i32, i32
  }
}

</mosaic_0001>

<bundles_post_ra>
// kernel: box_head_mlp.1
= control target key start
LH: loop header
LB: loop body
LE: loop exit
PB: predicated region body
PF: predicated region fallthrough
CT: control target
= control target key end

     0   :  { %14 = vsyncpa [#allocation3], 0  ;;  %s1052_s0 = inlined_call_operand.vmem [shape: bf16[128,128], index: 0, kind: input, shape index: {}]   ;;  %s1053_s1 = inlined_call_operand.vmem [shape: bf16[128,128], index: 1, kind: input, shape index: {}]   ;;  %s1054_s2 = inlined_call_operand.vmem [shape: f32[1,128], index: 2, kind: input, shape index: {}]   ;;  %s1055_s3 = inlined_call_operand.hbm [shape: bf16[128,128], index: 3, kind: input, shape index: {}]   ;;  %s1056_s4 = inlined_call_operand.vmem [shape: f32[1,128], index: 4, kind: input, shape index: {}]   ;;  %s1057_s5 = inlined_call_operand.hbm [shape: bf16[128,128], index: 5, kind: input, shape index: {}]   ;;  %s1058_s6 = inlined_call_operand.vmem [shape: f32[1,128], index: 6, kind: input, shape index: {}]   ;;  %s1059_s7 = inlined_call_operand.vmem [shape: f32[128,128], index: 7, kind: output, shape index: {0}]   ;;  %s1060_s8 = inlined_call_operand.vmem [shape: f32[128,128], index: 8, kind: output, shape index: {1}]  }
   0x1   :  { %s26_s29 = sshll.u32 %s1055_s3, 4  ;;  %s27_s29 = int_to_ptr.hbm [resolvable:$true] %s26_s29 }
   0x2   :  { %15 = vsyncpa [#allocation5], 0  ;;  %s808_s30 = smov [#allocation2]   ;;  %s41_s12 = sshll.u32 %s1057_s5, 4  ;;  %s42_s12 = int_to_ptr.hbm [resolvable:$true] %s41_s12 }
   0x3   :  { %s28_s9 = sshll.u32 %s808_s30, 4  ;;  %s809_s13 = smov 64   ;;  %s29_s9 = int_to_ptr.vmem [resolvable:$true] %s28_s9 }
   0x4   :  { %s810_s14 = smov 4   ;;  %s811_s15 = smov [#allocation4]  }
   0x5   :  { %34 = dma.hbm_to_vmem [thread:$0]  %s27_s29, 1024, %s29_s9, [#allocation3], %s809_s13, %s809_s13, %s810_s14  }
   0x6   :  { %s43_s16 = sshll.u32 %s811_s15, 4  ;;  %s44_s16 = int_to_ptr.vmem [resolvable:$true] %s43_s16 }
   0x7   :  { %49 = dma.hbm_to_vmem [thread:$0]  %s42_s12, 1024, %s44_s16, [#allocation5], %s809_s13, %s809_s13, %s810_s14  }
   0x8   :  { %804 = dma.done.wait [#allocation3], 1024  }
   0x9   :  { %805 = vsyncadd [#allocation3], 4294966272 }
   0xa   :  { %806 = dma.done.wait [#allocation5], 1024  }
   0xb   :  { %807 = vsyncadd [#allocation5], 4294966272  ;;  %v708_v0 = vld [vmem:[%s1053_s1 + $0x38] sm:$0xff]  ;;  %v707_v1 = vld [vmem:[%s1053_s1 + $0x30] sm:$0xff] }
   0xc   :  { %192 = vmatpush.bf16.msra.mxu0 %v708_v0  ;;  %725 = vmatpush.bf16.msra.mxu3 %v708_v0  ;;  %v706_v2 = vld [vmem:[%s1053_s1 + $0x28] sm:$0xff]  ;;  %v705_v3 = vld [vmem:[%s1053_s1 + $0x20] sm:$0xff]  ;;  %v704_v4 = vld [vmem:[%s1053_s1 + $0x18] sm:$0xff] }
   0xd   :  { %v703_v5 = vld [vmem:[%s1053_s1 + $0x10] sm:$0xff]  ;;  %v702_v6 = vld [vmem:[%s1053_s1 + $0x8] sm:$0xff]  ;;  %v701_v7 = vld [vmem:[%s1053_s1] sm:$0xff] }
   0xe   :  { %v693_v8 = vld [vmem:[%s1052_s0] sm:$0xff]  ;;  %v699_v9 = vld [vmem:[%s1052_s0 + $0x30] sm:$0xff]  ;;  %v694_v10 = vld [vmem:[%s1052_s0 + $0x8] sm:$0xff] }
   0xf   :  { %v700_v11 = vld [vmem:[%s1052_s0 + $0x38] sm:$0xff]  ;;  %v695_v12 = vld [vmem:[%s1052_s0 + $0x10] sm:$0xff]  ;;  %v714_v16 = vld [vmem:[#allocation2 + $0x28] sm:$0xff] }
  0x10   :  { %193 = vmatpush.bf16.msra.mxu0 %v707_v1  ;;  %726 = vmatpush.bf16.msra.mxu3 %v707_v1  ;;  %v696_v13 = vld [vmem:[%s1052_s0 + $0x18] sm:$0xff]  ;;  %v715_v15 = vld [vmem:[#allocation2 + $0x30] sm:$0xff]  ;;  %v713_v17 = vld [vmem:[#allocation2 + $0x20] sm:$0xff] }
  0x11   :  { %v716_v14 = vld [vmem:[#allocation2 + $0x38] sm:$0xff]  ;;  %v697_v18 = vld [vmem:[%s1052_s0 + $0x20] sm:$0xff]  ;;  %v698_v19 = vld [vmem:[%s1052_s0 + $0x28] sm:$0xff] }
  0x12   :  { %333 = vmatpush.bf16.msra.mxu1 %v716_v14  ;;  %v712_v20 = vld [vmem:[#allocation2 + $0x18] sm:$0xff]  ;;  %v711_v21 = vld [vmem:[#allocation2 + $0x10] sm:$0xff]  ;;  %v710_v22 = vld [vmem:[#allocation2 + $0x8] sm:$0xff] }
  0x13   :  { %v709_v23 = vld [vmem:[#allocation2] sm:$0xff] }
  0x14   :  { %194 = vmatpush.bf16.msra.mxu0 %v706_v2  ;;  %727 = vmatpush.bf16.msra.mxu3 %v706_v2  ;;  %v914_v25 = vld [vmem:[%s1054_s2] ss:$0 sm:$0xff] }
  0x16   :  { %334 = vmatpush.bf16.msra.mxu1 %v715_v15 }
  0x18   :  { %195 = vmatpush.bf16.msra.mxu0 %v705_v3  ;;  %728 = vmatpush.bf16.msra.mxu3 %v705_v3  ;;  %v724_v3 = vld [vmem:[#allocation4 + $0x38] sm:$0xff] }
  0x19   :  { %490 = vmatpush.bf16.msra.mxu2 %v724_v3 }
  0x1a   :  { %335 = vmatpush.bf16.msra.mxu1 %v714_v16 }
  0x1c   :  { %196 = vmatpush.bf16.msra.mxu0 %v704_v4  ;;  %729 = vmatpush.bf16.msra.mxu3 %v704_v4 }
  0x1e   :  { %336 = vmatpush.bf16.msra.mxu1 %v713_v17 }
  0x20   :  { %197 = vmatpush.bf16.msra.mxu0 %v703_v5  ;;  %730 = vmatpush.bf16.msra.mxu3 %v703_v5  ;;  %v723_v5 = vld [vmem:[#allocation4 + $0x30] sm:$0xff] }
  0x21   :  { %491 = vmatpush.bf16.msra.mxu2 %v723_v5 }
  0x22   :  { %337 = vmatpush.bf16.msra.mxu1 %v712_v20 }
  0x24   :  { %198 = vmatpush.bf16.msra.mxu0 %v702_v6  ;;  %731 = vmatpush.bf16.msra.mxu3 %v702_v6  ;;  %v722_v6 = vld [vmem:[#allocation4 + $0x28] sm:$0xff] }
  0x25   :  { %492 = vmatpush.bf16.msra.mxu2 %v722_v6 }
  0x26   :  { %338 = vmatpush.bf16.msra.mxu1 %v711_v21 }
  0x28   :  { %199 = vmatpush.bf16.msra.mxu0 %v701_v7  ;;  %732 = vmatpush.bf16.msra.mxu3 %v701_v7 }
  0x2a   :  { %339 = vmatpush.bf16.msra.mxu1 %v710_v22 }
  0x2b   :  { %200 = vmatmul.bf16.vlgmr.msra.gmra.mxu0 %v693_v8  ;;  %230 = vmatmul.bf16.vlgmr.msra.gmra.mxu3 %v699_v9 }
  0x2c   :  { %733 = vmatpush.bf16.msrb.mxu3 %v716_v14 }
  0x2e   :  { %340 = vmatpush.bf16.msra.mxu1 %v709_v23 }
  0x30   :  { %734 = vmatpush.bf16.msrb.mxu3 %v715_v15 }
  0x34   :  { %735 = vmatpush.bf16.msrb.mxu3 %v714_v16 }
  0x38   :  { %736 = vmatpush.bf16.msrb.mxu3 %v713_v17 }
  0x3b   :  { %205 = vmatmul.bf16.gmra.mxu0 %v694_v10  ;;  %235 = vmatmul.bf16.gmra.mxu3 %v700_v11  ;;  %v721_v10 = vld [vmem:[#allocation4 + $0x20] sm:$0xff] }
  0x3c   :  { %737 = vmatpush.bf16.msrb.mxu3 %v712_v20  ;;  %493 = vmatpush.bf16.msra.mxu2 %v721_v10 }
  0x40   :  { %738 = vmatpush.bf16.msrb.mxu3 %v711_v21  ;;  %v720_v21 = vld [vmem:[#allocation4 + $0x18] sm:$0xff] }
  0x41   :  { %494 = vmatpush.bf16.msra.mxu2 %v720_v21 }
  0x44   :  { %739 = vmatpush.bf16.msrb.mxu3 %v710_v22  ;;  %v719_v22 = vld [vmem:[#allocation4 + $0x10] sm:$0xff] }
  0x45   :  { %495 = vmatpush.bf16.msra.mxu2 %v719_v22 }
  0x48   :  { %740 = vmatpush.bf16.msrb.mxu3 %v709_v23  ;;  %v718_v23 = vld [vmem:[#allocation4 + $0x8] sm:$0xff] }
  0x49   :  { %496 = vmatpush.bf16.msra.mxu2 %v718_v23 }
  0x4b   :  { %210 = vmatmul.bf16.gmra.mxu0 %v695_v12 }
  0x4c   :  { %741 = vmatpush.bf16.msra.mxu3 %v724_v3 }
  0x50   :  { %742 = vmatpush.bf16.msra.mxu3 %v723_v5 }
  0x54   :  { %743 = vmatpush.bf16.msra.mxu3 %v722_v6 }
  0x58   :  { %744 = vmatpush.bf16.msra.mxu3 %v721_v10 }
  0x5b   :  { %215 = vmatmul.bf16.gmra.mxu0 %v696_v13 }
  0x5c   :  { %745 = vmatpush.bf16.msra.mxu3 %v720_v21 }
  0x60   :  { %746 = vmatpush.bf16.msra.mxu3 %v719_v22 }
  0x64   :  { %747 = vmatpush.bf16.msra.mxu3 %v718_v23 }
  0x6b   :  { %220 = vmatmul.bf16.gmra.mxu0 %v697_v18 }
  0x7b   :  { %225 = vmatmul.bf16.gmra.mxu0 %v698_v19 }
  0xa8   :  { %v201_v24 = vpop.f32.mrf.mxu0 }
  0xa9   :  { %v202_v27 = vadd.f32 %v914_v25, %v201_v24  ;;  %v717_v24 = vld [vmem:[#allocation4] sm:$0xff] }
  0xaa   :  { %497 = vmatpush.bf16.msra.mxu2 %v717_v24  ;;  %748 = vmatpush.bf16.msra.mxu3 %v717_v24 }
  0xab   :  { %v241_v30 = vmax.f32 %v202_v27, 0.0 }
  0xae   :  { %v231_v26 = vpop.f32.mrf.mxu3 }
  0xaf   :  { %v232_v32 = vadd.f32 %v914_v25, %v231_v26 }
  0xb0   :  { %v203_v28 = vpop.f32.mrf.mxu0 }
  0xb1   :  { %v204_v29 = vadd.f32 %v914_v25, %v203_v28  ;;  %v253_v35 = vmax.f32 %v232_v32, 0.0 }
  0xb3   :  { %v242_v31 = vmax.f32 %v204_v29, 0.0 }
  0xb5   :  { %v257_v33 = vpack.c.bf16 %v242_v31, %v241_v30 }
  0xb6   :  { %v233_v34 = vpop.f32.mrf.mxu3 }
  0xb7   :  { %341 = vmatmul.bf16.vlgmr.msra.gmra.mxu1 %v257_v33  ;;  %v234_v36 = vadd.f32 %v914_v25, %v233_v34 }
  0xb8   :  { %v206_v37 = vpop.f32.mrf.mxu0 }
  0xb9   :  { %v254_v38 = vmax.f32 %v234_v36, 0.0  ;;  %v207_v41 = vadd.f32 %v914_v25, %v206_v37 }
  0xbb   :  { %v263_v39 = vpack.c.bf16 %v254_v38, %v253_v35  ;;  %v243_v44 = vmax.f32 %v207_v41, 0.0 }
  0xbd   :  { %371 = vmatmul.bf16.vlgmr.msrb.gmra.mxu3 %v263_v39 }
  0xbe   :  { %v236_v40 = vpop.f32.mrf.mxu3 }
  0xbf   :  { %v237_v46 = vadd.f32 %v914_v25, %v236_v40 }
  0xc0   :  { %v208_v42 = vpop.f32.mrf.mxu0 }
  0xc1   :  { %v209_v43 = vadd.f32 %v914_v25, %v208_v42  ;;  %v255_v49 = vmax.f32 %v237_v46, 0.0 }
  0xc3   :  { %v244_v45 = vmax.f32 %v209_v43, 0.0 }
  0xc5   :  { %v258_v47 = vpack.c.bf16 %v244_v45, %v243_v44 }
  0xc6   :  { %v238_v48 = vpop.f32.mrf.mxu3 }
  0xc7   :  { %346 = vmatmul.bf16.gmra.mxu1 %v258_v47  ;;  %v239_v50 = vadd.f32 %v914_v25, %v238_v48 }
  0xc8   :  { %v211_v51 = vpop.f32.mrf.mxu0 }
  0xc9   :  { %v256_v52 = vmax.f32 %v239_v50, 0.0  ;;  %v212_v54 = vadd.f32 %v914_v25, %v211_v51 }
  0xcb   :  { %v264_v53 = vpack.c.bf16 %v256_v52, %v255_v49  ;;  %v245_v57 = vmax.f32 %v212_v54, 0.0 }
  0xcd   :  { %376 = vmatmul.bf16.gmra.mxu3 %v264_v53 }
  0xd0   :  { %v213_v55 = vpop.f32.mrf.mxu0 }
  0xd1   :  { %v214_v56 = vadd.f32 %v914_v25, %v213_v55 }
  0xd3   :  { %v246_v58 = vmax.f32 %v214_v56, 0.0 }
  0xd5   :  { %v259_v59 = vpack.c.bf16 %v246_v58, %v245_v57 }
  0xd7   :  { %351 = vmatmul.bf16.gmra.mxu1 %v259_v59 }
  0xd8   :  { %v216_v60 = vpop.f32.mrf.mxu0 }
  0xd9   :  { %v217_v61 = vadd.f32 %v914_v25, %v216_v60 }
  0xdb   :  { %v247_v0 = vmax.f32 %v217_v61, 0.0 }
  0xe0   :  { %v218_v62 = vpop.f32.mrf.mxu0 }
  0xe1   :  { %v219_v63 = vadd.f32 %v914_v25, %v218_v62 }
  0xe3   :  { %v248_v1 = vmax.f32 %v219_v63, 0.0 }
  0xe5   :  { %v260_v2 = vpack.c.bf16 %v248_v1, %v247_v0 }
  0xe7   :  { %356 = vmatmul.bf16.gmra.mxu1 %v260_v2 }
  0xe8   :  { %v221_v4 = vpop.f32.mrf.mxu0 }
  0xe9   :  { %v222_v7 = vadd.f32 %v914_v25, %v221_v4 }
  0xeb   :  { %v249_v11 = vmax.f32 %v222_v7, 0.0 }
  0xf0   :  { %v223_v8 = vpop.f32.mrf.mxu0 }
  0xf1   :  { %v224_v9 = vadd.f32 %v914_v25, %v223_v8 }
  0xf3   :  { %v250_v12 = vmax.f32 %v224_v9, 0.0 }
  0xf5   :  { %v261_v13 = vpack.c.bf16 %v250_v12, %v249_v11 }
  0xf7   :  { %361 = vmatmul.bf16.gmra.mxu1 %v261_v13 }
  0xf8   :  { %v226_v14 = vpop.f32.mrf.mxu0 }
  0xf9   :  { %v227_v15 = vadd.f32 %v914_v25, %v226_v14 }
  0xfb   :  { %v251_v18 = vmax.f32 %v227_v15, 0.0 }
 0x100   :  { %v228_v16 = vpop.f32.mrf.mxu0 }
 0x101   :  { %v229_v17 = vadd.f32 %v914_v25, %v228_v16  ;;  %v935_v25 = vld [vmem:[%s1056_s4] ss:$0 sm:$0xff] }
 0x103   :  { %v252_v19 = vmax.f32 %v229_v17, 0.0 }
 0x105   :  { %v262_v20 = vpack.c.bf16 %v252_v19, %v251_v18  ;;  %v755_v18 = vld [vmem:[%s1058_s6] ss:$0 sm:$0xff] }
 0x107   :  { %366 = vmatmul.bf16.gmra.mxu1 %v262_v20 }
 0x134   :  { %v342_v26 = vpop.f32.mrf.mxu1 }
 0x135   :  { %v343_v27 = vadd.f32 %v935_v25, %v342_v26 }
 0x137   :  { %v382_v28 = vmax.f32 %v343_v27, 0.0 }
 0x139   :  { %398 = vst [vmem:[%s1059_s7] sm:$0xff] %v382_v28 }
 0x13c   :  { %v344_v29 = vpop.f32.mrf.mxu1 }
 0x13d   :  { %v345_v30 = vadd.f32 %v935_v25, %v344_v29 }
 0x13f   :  { %v383_v31 = vmax.f32 %v345_v30, 0.0 }
 0x140   :  { %v372_v32 = vpop.f32.mrf.mxu3 }
 0x141   :  { %399 = vst [vmem:[%s1059_s7 + $0x8] sm:$0xff] %v383_v31  ;;  %v414_v33 = vpack.c.bf16 %v383_v31, %v382_v28  ;;  %v373_v34 = vadd.f32 %v935_v25, %v372_v32 }
 0x143   :  { %498 = vmatmul.bf16.vlgmr.msra.gmra.mxu2 %v414_v33  ;;  %v394_v35 = vmax.f32 %v373_v34, 0.0 }
 0x144   :  { %v347_v36 = vpop.f32.mrf.mxu1 }
 0x145   :  { %v348_v37 = vadd.f32 %v935_v25, %v347_v36  ;;  %410 = vst [vmem:[%s1059_s7 + $0x60] sm:$0xff] %v394_v35 }
 0x147   :  { %v384_v38 = vmax.f32 %v348_v37, 0.0 }
 0x148   :  { %v374_v39 = vpop.f32.mrf.mxu3 }
 0x149   :  { %400 = vst [vmem:[%s1059_s7 + $0x10] sm:$0xff] %v384_v38  ;;  %v375_v40 = vadd.f32 %v935_v25, %v374_v39 }
 0x14b   :  { %v395_v41 = vmax.f32 %v375_v40, 0.0 }
 0x14c   :  { %v349_v42 = vpop.f32.mrf.mxu1 }
 0x14d   :  { %v350_v43 = vadd.f32 %v935_v25, %v349_v42  ;;  %411 = vst [vmem:[%s1059_s7 + $0x68] sm:$0xff] %v395_v41  ;;  %v420_v44 = vpack.c.bf16 %v395_v41, %v394_v35 }
 0x14f   :  { %v385_v45 = vmax.f32 %v350_v43, 0.0  ;;  %528 = vmatmul.bf16.vlgmr.msra.gmra.mxu3 %v420_v44 }
 0x150   :  { %v377_v46 = vpop.f32.mrf.mxu3 }
 0x151   :  { %401 = vst [vmem:[%s1059_s7 + $0x18] sm:$0xff] %v385_v45  ;;  %v415_v47 = vpack.c.bf16 %v385_v45, %v384_v38  ;;  %v378_v48 = vadd.f32 %v935_v25, %v377_v46 }
 0x153   :  { %503 = vmatmul.bf16.gmra.mxu2 %v415_v47  ;;  %v396_v49 = vmax.f32 %v378_v48, 0.0 }
 0x154   :  { %v352_v50 = vpop.f32.mrf.mxu1 }
 0x155   :  { %v353_v51 = vadd.f32 %v935_v25, %v352_v50  ;;  %412 = vst [vmem:[%s1059_s7 + $0x70] sm:$0xff] %v396_v49 }
 0x157   :  { %v386_v52 = vmax.f32 %v353_v51, 0.0 }
 0x158   :  { %v379_v53 = vpop.f32.mrf.mxu3 }
 0x159   :  { %402 = vst [vmem:[%s1059_s7 + $0x20] sm:$0xff] %v386_v52  ;;  %v380_v54 = vadd.f32 %v935_v25, %v379_v53 }
 0x15b   :  { %v397_v55 = vmax.f32 %v380_v54, 0.0 }
 0x15c   :  { %v354_v56 = vpop.f32.mrf.mxu1 }
 0x15d   :  { %v355_v57 = vadd.f32 %v935_v25, %v354_v56  ;;  %413 = vst [vmem:[%s1059_s7 + $0x78] sm:$0xff] %v397_v55  ;;  %v421_v58 = vpack.c.bf16 %v397_v55, %v396_v49 }
 0x15f   :  { %v387_v59 = vmax.f32 %v355_v57, 0.0  ;;  %533 = vmatmul.bf16.gmra.mxu3 %v421_v58 }
 0x161   :  { %403 = vst [vmem:[%s1059_s7 + $0x28] sm:$0xff] %v387_v59  ;;  %v416_v60 = vpack.c.bf16 %v387_v59, %v386_v52 }
 0x163   :  { %508 = vmatmul.bf16.gmra.mxu2 %v416_v60 }
 0x164   :  { %v357_v61 = vpop.f32.mrf.mxu1 }
 0x165   :  { %v358_v62 = vadd.f32 %v935_v25, %v357_v61 }
 0x167   :  { %v388_v63 = vmax.f32 %v358_v62, 0.0 }
 0x169   :  { %404 = vst [vmem:[%s1059_s7 + $0x30] sm:$0xff] %v388_v63 }
 0x16c   :  { %v359_v0 = vpop.f32.mrf.mxu1 }
 0x16d   :  { %v360_v1 = vadd.f32 %v935_v25, %v359_v0 }
 0x16f   :  { %v389_v2 = vmax.f32 %v360_v1, 0.0 }
 0x171   :  { %405 = vst [vmem:[%s1059_s7 + $0x38] sm:$0xff] %v389_v2  ;;  %v417_v3 = vpack.c.bf16 %v389_v2, %v388_v63 }
 0x173   :  { %513 = vmatmul.bf16.gmra.mxu2 %v417_v3 }
 0x174   :  { %v362_v4 = vpop.f32.mrf.mxu1 }
 0x175   :  { %v363_v5 = vadd.f32 %v935_v25, %v362_v4 }
 0x177   :  { %v390_v6 = vmax.f32 %v363_v5, 0.0 }
 0x179   :  { %406 = vst [vmem:[%s1059_s7 + $0x40] sm:$0xff] %v390_v6 }
 0x17c   :  { %v364_v7 = vpop.f32.mrf.mxu1 }
 0x17d   :  { %v365_v8 = vadd.f32 %v935_v25, %v364_v7 }
 0x17f   :  { %v391_v9 = vmax.f32 %v365_v8, 0.0 }
 0x181   :  { %407 = vst [vmem:[%s1059_s7 + $0x48] sm:$0xff] %v391_v9  ;;  %v418_v10 = vpack.c.bf16 %v391_v9, %v390_v6 }
 0x183   :  { %518 = vmatmul.bf16.gmra.mxu2 %v418_v10 }
 0x184   :  { %v367_v11 = vpop.f32.mrf.mxu1 }
 0x185   :  { %v368_v12 = vadd.f32 %v935_v25, %v367_v11 }
 0x187   :  { %v392_v13 = vmax.f32 %v368_v12, 0.0 }
 0x189   :  { %408 = vst [vmem:[%s1059_s7 + $0x50] sm:$0xff] %v392_v13 }
 0x18c   :  { %v369_v14 = vpop.f32.mrf.mxu1 }
 0x18d   :  { %v370_v15 = vadd.f32 %v935_v25, %v369_v14 }
 0x18f   :  { %v393_v16 = vmax.f32 %v370_v15, 0.0 }
 0x191   :  { %409 = vst [vmem:[%s1059_s7 + $0x58] sm:$0xff] %v393_v16  ;;  %v419_v17 = vpack.c.bf16 %v393_v16, %v392_v13 }
 0x193   :  { %523 = vmatmul.bf16.gmra.mxu2 %v419_v17 }
 0x1c6   :  { %v499_v19 = vpop.f32.mrf.mxu2 }
 0x1c7   :  { %v500_v20 = vadd.f32 %v755_v18, %v499_v19 }
 0x1c9   :  { %539 = vst [vmem:[%s1060_s8] sm:$0xff] %v500_v20 }
 0x1ce   :  { %v501_v21 = vpop.f32.mrf.mxu2 }
 0x1cf   :  { %v502_v22 = vadd.f32 %v755_v18, %v501_v21 }
 0x1d1   :  { %540 = vst [vmem:[%s1060_s8 + $0x8] sm:$0xff] %v502_v22 }
 0x1d2   :  { %v529_v23 = vpop.f32.mrf.mxu3 }
 0x1d3   :  { %v530_v24 = vadd.f32 %v755_v18, %v529_v23 }
 0x1d5   :  { %551 = vst [vmem:[%s1060_s8 + $0x60] sm:$0xff] %v530_v24 }
 0x1d6   :  { %v504_v25 = vpop.f32.mrf.mxu2 }
 0x1d7   :  { %v505_v26 = vadd.f32 %v755_v18, %v504_v25 }
 0x1d9   :  { %541 = vst [vmem:[%s1060_s8 + $0x10] sm:$0xff] %v505_v26 }
 0x1da   :  { %v531_v27 = vpop.f32.mrf.mxu3 }
 0x1db   :  { %v532_v28 = vadd.f32 %v755_v18, %v531_v27 }
 0x1dd   :  { %552 = vst [vmem:[%s1060_s8 + $0x68] sm:$0xff] %v532_v28 }
 0x1de   :  { %v506_v29 = vpop.f32.mrf.mxu2 }
 0x1df   :  { %v507_v30 = vadd.f32 %v755_v18, %v506_v29 }
 0x1e1   :  { %542 = vst [vmem:[%s1060_s8 + $0x18] sm:$0xff] %v507_v30 }
 0x1e2   :  { %v534_v31 = vpop.f32.mrf.mxu3 }
 0x1e3   :  { %v535_v32 = vadd.f32 %v755_v18, %v534_v31 }
 0x1e5   :  { %553 = vst [vmem:[%s1060_s8 + $0x70] sm:$0xff] %v535_v32 }
 0x1e6   :  { %v509_v33 = vpop.f32.mrf.mxu2 }
 0x1e7   :  { %v510_v34 = vadd.f32 %v755_v18, %v509_v33 }
 0x1e9   :  { %543 = vst [vmem:[%s1060_s8 + $0x20] sm:$0xff] %v510_v34 }
 0x1ea   :  { %v536_v35 = vpop.f32.mrf.mxu3 }
 0x1eb   :  { %v537_v36 = vadd.f32 %v755_v18, %v536_v35 }
 0x1ed   :  { %554 = vst [vmem:[%s1060_s8 + $0x78] sm:$0xff] %v537_v36 }
 0x1ee   :  { %v511_v37 = vpop.f32.mrf.mxu2 }
 0x1ef   :  { %v512_v38 = vadd.f32 %v755_v18, %v511_v37 }
 0x1f1   :  { %544 = vst [vmem:[%s1060_s8 + $0x28] sm:$0xff] %v512_v38 }
 0x1f6   :  { %v514_v39 = vpop.f32.mrf.mxu2 }
 0x1f7   :  { %v515_v40 = vadd.f32 %v755_v18, %v514_v39 }
 0x1f9   :  { %545 = vst [vmem:[%s1060_s8 + $0x30] sm:$0xff] %v515_v40 }
 0x1fe   :  { %v516_v41 = vpop.f32.mrf.mxu2 }
 0x1ff   :  { %v517_v42 = vadd.f32 %v755_v18, %v516_v41 }
 0x201   :  { %546 = vst [vmem:[%s1060_s8 + $0x38] sm:$0xff] %v517_v42 }
 0x206   :  { %v519_v43 = vpop.f32.mrf.mxu2 }
 0x207   :  { %v520_v44 = vadd.f32 %v755_v18, %v519_v43 }
 0x209   :  { %547 = vst [vmem:[%s1060_s8 + $0x40] sm:$0xff] %v520_v44 }
 0x20e   :  { %v521_v45 = vpop.f32.mrf.mxu2 }
 0x20f   :  { %v522_v46 = vadd.f32 %v755_v18, %v521_v45 }
 0x211   :  { %548 = vst [vmem:[%s1060_s8 + $0x48] sm:$0xff] %v522_v46 }
 0x216   :  { %v524_v47 = vpop.f32.mrf.mxu2 }
 0x217   :  { %v525_v48 = vadd.f32 %v755_v18, %v524_v47 }
 0x219   :  { %549 = vst [vmem:[%s1060_s8 + $0x50] sm:$0xff] %v525_v48 }
 0x21e   :  { %v526_v49 = vpop.f32.mrf.mxu2 }
 0x21f   :  { %v527_v50 = vadd.f32 %v755_v18, %v526_v49 }
 0x221   :  { %550 = vst [vmem:[%s1060_s8 + $0x58] sm:$0xff] %v527_v50 }
 0x222   :  { %563 = vsyncpa [#allocation3], 1 }
 0x223   :  { %564 = vsyncpa [#allocation5], 1 }

</bundles_post_ra>
